<compile_context>
chip_gen: v6e
topology: v6e:2x2x1
jax: 0.10.0
libtpu: 0.0.40
codegen_flags: <defaults>
</compile_context>

<pallas_src>
import numpy as np
import jax
import jax.numpy as jnp
from jax.experimental import pallas as pl
from jax.experimental.pallas import tpu as pltpu

LANE = 128


def _round_up(a, b):
    return (a + b - 1) // b * b


def _cdiv(a, b):
    return (a + b - 1) // b


def made_kernel(x_ref, w1_ref, b1_ref, w2_ref, b2_ref, w3_ref, wa_ref, b3_ref, o_ref):
    # x_ref: (TB, D) f32.  Weights bf16, biases f32, output f32.
    xb = x_ref[...].astype(jnp.bfloat16)
    h1 = jnp.dot(xb, w1_ref[...], preferred_element_type=jnp.float32) + b1_ref[...]
    h1 = jnp.maximum(h1, 0.0)                                        # ReLU (f32, VPU)
    h2 = jnp.dot(h1.astype(jnp.bfloat16), w2_ref[...],
                 preferred_element_type=jnp.float32) + b2_ref[...]
    h2 = jnp.maximum(h2, 0.0)                                        # ReLU (f32, VPU)
    # Output layer.
    out = jnp.dot(h2.astype(jnp.bfloat16), w3_ref[...],
                  preferred_element_type=jnp.float32)
    # Masked autoregressive skip as a separate small-K dot (no in-kernel concat);
    # x is re-read from VMEM here so its live range doesn't span the whole body.
    out = out + jnp.dot(x_ref[...].astype(jnp.bfloat16), wa_ref[...],
                        preferred_element_type=jnp.float32)
    out = out + b3_ref[...]
    o_ref[...] = jax.nn.sigmoid(out)                                 # f32, EUP


def made_forward(x, params, input_h, input_w, *, tile_batch=512):
    D = input_h * input_w
    Hp = params["b1"].shape[-1]

    x2d = x.reshape(-1, D).astype(jnp.float32)
    B = x2d.shape[0]
    # Batch tile: big enough to amortize the ~0.35us per-grid-step overhead, but split
    # so there are >= 2 tiles whenever the batch allows it (lets the "parallel" axis
    # shard across v7x's two TensorCores).  At TB=512, x + out double-buffered is
    # ~1 MiB and the bf16 weights ~75 KiB -- tiny vs. any generation's VMEM.
    TB = min(tile_batch, max(8, _round_up(_cdiv(B, 2), 8)))
    B_pad = _round_up(B, TB)
    n_tiles = B_pad // TB

    # Only the batch dim is padded (features stay at D); no-op when B % TB == 0.
    x_in = x2d if B_pad == B else jnp.zeros((B_pad, D), jnp.float32).at[:B].set(x2d)

    flops = 2 * B_pad * (D * Hp + Hp * Hp + Hp * D + D * D)
    bytes_accessed = (
        B_pad * D * 4 * 2                                            # x in + out (f32)
        + (params["w1t"].size + params["w2t"].size
           + params["w3t"].size + params["wat"].size) * 2            # bf16 weights
        + (params["b1"].size + params["b2"].size + params["b3"].size) * 4)

    const = lambda i: (0, 0)  # weights / biases: VMEM-resident, DMA'd once
    out = pl.pallas_call(
        made_kernel,
        out_shape=jax.ShapeDtypeStruct((B_pad, D), jnp.float32),
        grid_spec=pltpu.PrefetchScalarGridSpec(
            num_scalar_prefetch=0,
            grid=(n_tiles,),
            in_specs=[
                pl.BlockSpec((TB, D), lambda i: (i, 0)),             # x (unpadded feats)
                pl.BlockSpec((D, Hp), const),                        # w1t
                pl.BlockSpec((1, Hp), const),                        # b1
                pl.BlockSpec((Hp, Hp), const),                       # w2t
                pl.BlockSpec((1, Hp), const),                        # b2
                pl.BlockSpec((Hp, D), const),                        # w3t
                pl.BlockSpec((D, D), const),                         # wat (masked skip)
                pl.BlockSpec((1, D), const),                         # b3
            ],
            out_specs=pl.BlockSpec((TB, D), lambda i: (i, 0)),
        ),
        compiler_params=pltpu.CompilerParams(
            dimension_semantics=("parallel",)),
        cost_estimate=pl.CostEstimate(
            flops=flops,
            transcendentals=B_pad * D,
            bytes_accessed=bytes_accessed),
    )(x_in, params["w1t"], params["b1"], params["w2t"], params["b2"],
      params["w3t"], params["wat"], params["b3"])

    # Row slice on a D-wide output is contiguous; reshape is free.
    return out[:B].reshape(-1, 1, input_h, input_w)


def init_made_params(key, input_h, input_w, hidden_size, layer_size):
    assert layer_size == 2, "kernel specialized for layer_size=2 (3 masked linears)"
    D = input_h * input_w
    H = hidden_size
    Hp = _round_up(H, LANE)
    dims = [D, H, H, D]

    # --- MADE mask construction (mirrors Made.update_mask, natural order) ---
    # TODO(synk): connectivity uses a fixed NumPy RNG, not PyTorch's RNG state.
    rng = np.random.RandomState(0)
    m = {0: np.arange(D, dtype=np.int64)}
    for l in range(1, layer_size + 1):
        m[l] = rng.randint(int(m[l - 1].min()), D - 1, size=(hidden_size,))
    masks = [(m[l - 1][:, None] <= m[l][None, :]).astype(np.float32)
             for l in range(1, layer_size + 1)]
    masks.append((m[layer_size][:, None] < m[0][None, :]).astype(np.float32))
    # MadeLayer stores mask.T with shape (out, in), multiplied into weight.

    keys = jax.random.split(key, 2 * (layer_size + 1) + 1)
    eff, biases = [], []
    for i, (n_in, n_out) in enumerate(zip(dims, dims[1:])):
        W = jax.random.normal(keys[2 * i], (n_out, n_in), jnp.float32)   # ~ normal_()
        b = jax.random.normal(keys[2 * i + 1], (n_out,), jnp.float32)
        W_eff = (W * jnp.asarray(masks[i].T)).T                          # (in, out)
        eff.append(W_eff)
        biases.append(b)
    Wa = jax.random.normal(keys[-1], (D, D), jnp.float32)
    maska = jnp.tril(jnp.ones((D, D), jnp.float32), -1)
    wat = (Wa * maska).T                                                 # (D, D)

    def pad2(a, r, c):
        return jnp.zeros((r, c), a.dtype).at[:a.shape[0], :a.shape[1]].set(a)

    params = {
        "w1t": pad2(eff[0], D, Hp).astype(jnp.bfloat16),                 # (D, Hp)
        "b1": pad2(biases[0].reshape(1, -1), 1, Hp),                     # f32
        "w2t": pad2(eff[1], Hp, Hp).astype(jnp.bfloat16),                # (Hp, Hp)
        "b2": pad2(biases[1].reshape(1, -1), 1, Hp),                     # f32
        "w3t": pad2(eff[2], Hp, D).astype(jnp.bfloat16),                 # (Hp, D)
        "wat": wat.astype(jnp.bfloat16),                                 # (D, D)
        "b3": biases[2].reshape(1, -1),                                  # (1, D) f32
    }
    return params


def made_reference(x, params, input_h, input_w):
    # Pure-JAX reference mirroring the kernel's math (same bf16 weights / f32 accum).
    D = input_h * input_w
    x2d = x.reshape(-1, D).astype(jnp.float32)
    xb = x2d.astype(jnp.bfloat16)
    h1 = jnp.maximum(
        jnp.dot(xb, params["w1t"], preferred_element_type=jnp.float32) + params["b1"], 0.0)
    h2 = jnp.maximum(
        jnp.dot(h1.astype(jnp.bfloat16), params["w2t"],
                preferred_element_type=jnp.float32) + params["b2"], 0.0)
    out = (jnp.dot(h2.astype(jnp.bfloat16), params["w3t"],
                   preferred_element_type=jnp.float32)
           + jnp.dot(xb, params["wat"], preferred_element_type=jnp.float32)
           + params["b3"])
    return jax.nn.sigmoid(out).reshape(-1, 1, input_h, input_w)


if __name__ == "__main__":
    # Small, forward-consistent shapes: batch=2, 1x8x8 "images", hidden=32, 2 hidden layers.
    INPUT_H, INPUT_W, HIDDEN, LAYERS, BATCH = 8, 8, 32, 2, 2

    key = jax.random.PRNGKey(0)
    k_x, k_p = jax.random.split(key)
    params = init_made_params(k_p, INPUT_H, INPUT_W, HIDDEN, LAYERS)
    x = jax.random.uniform(k_x, (BATCH, 1, INPUT_H, INPUT_W), jnp.float32)

    y = jax.block_until_ready(made_forward(x, params, INPUT_H, INPUT_W))
    y_ref = jax.block_until_ready(made_reference(x, params, INPUT_H, INPUT_W))

    assert y.shape == (BATCH, 1, INPUT_H, INPUT_W)
    np.testing.assert_allclose(np.asarray(y), np.asarray(y_ref), rtol=1e-4, atol=1e-4)

    print("KERNEL_OK")
</pallas_src>

<mosaic_0001>
module attributes {stable_mosaic.version = 11 : i64} {
  func.func @made_kernel(%arg0: i32, %arg1: memref<8x64xf32, #tpu.memory_space<vmem>>, %arg2: memref<64x128xbf16, #tpu.memory_space<vmem>>, %arg3: memref<1x128xf32, #tpu.memory_space<vmem>>, %arg4: memref<128x128xbf16, #tpu.memory_space<vmem>>, %arg5: memref<1x128xf32, #tpu.memory_space<vmem>>, %arg6: memref<128x64xbf16, #tpu.memory_space<vmem>>, %arg7: memref<64x64xbf16, #tpu.memory_space<vmem>>, %arg8: memref<1x64xf32, #tpu.memory_space<vmem>>, %arg9: memref<8x64xf32, #tpu.memory_space<vmem>>) attributes {dimension_semantics = [#tpu.dimension_semantics<parallel>], iteration_bounds = array<i64: 1>, scalar_prefetch = 0 : i64, scratch_operands = 0 : i64, tpu.core_type = #tpu.core_type<tc>, window_params = [{transform_indices = @transform_0, window_bounds = array<i64: 8, 64>}, {pipeline_mode = #tpu.pipeline_mode<synchronous>, transform_indices = @transform_1, window_bounds = array<i64: 64, 128>}, {pipeline_mode = #tpu.pipeline_mode<synchronous>, transform_indices = @transform_2, window_bounds = array<i64: 1, 128>}, {pipeline_mode = #tpu.pipeline_mode<synchronous>, transform_indices = @transform_3, window_bounds = array<i64: 128, 128>}, {pipeline_mode = #tpu.pipeline_mode<synchronous>, transform_indices = @transform_4, window_bounds = array<i64: 1, 128>}, {pipeline_mode = #tpu.pipeline_mode<synchronous>, transform_indices = @transform_5, window_bounds = array<i64: 128, 64>}, {pipeline_mode = #tpu.pipeline_mode<synchronous>, transform_indices = @transform_6, window_bounds = array<i64: 64, 64>}, {pipeline_mode = #tpu.pipeline_mode<synchronous>, transform_indices = @transform_7, window_bounds = array<i64: 1, 64>}, {transform_indices = @transform_8, window_bounds = array<i64: 8, 64>}]} {
    %c0 = arith.constant 0 : index
    %c0_0 = arith.constant 0 : index
    %0 = vector.load %arg1[%c0, %c0_0] : memref<8x64xf32, #tpu.memory_space<vmem>>, vector<8x64xf32>
    %1 = arith.truncf %0 : vector<8x64xf32> to vector<8x64xbf16>
    %c0_1 = arith.constant 0 : index
    %c0_2 = arith.constant 0 : index
    %2 = vector.load %arg2[%c0_1, %c0_2] : memref<64x128xbf16, #tpu.memory_space<vmem>>, vector<64x128xbf16>
    %cst = arith.constant dense<0.000000e+00> : vector<8x128xf32>
    %3 = tpu.matmul %1, %2, %cst {dimension_numbers = #tpu.dot_dimension_numbers<[1], [0], [0], [1], [0, 0, 1, 1], [], []>} : vector<8x64xbf16>, vector<64x128xbf16>, vector<8x128xf32> -> vector<8x128xf32>
    %c0_3 = arith.constant 0 : index
    %c0_4 = arith.constant 0 : index
    %4 = vector.load %arg3[%c0_3, %c0_4] : memref<1x128xf32, #tpu.memory_space<vmem>>, vector<1x128xf32>
    %5 = vector.broadcast %4 : vector<1x128xf32> to vector<8x128xf32>
    %6 = arith.addf %3, %5 : vector<8x128xf32>
    %cst_5 = arith.constant 0.000000e+00 : f32
    %7 = vector.broadcast %cst_5 : f32 to vector<8x128xf32>
    %8 = arith.maximumf %6, %7 : vector<8x128xf32>
    %9 = arith.truncf %8 : vector<8x128xf32> to vector<8x128xbf16>
    %c0_6 = arith.constant 0 : index
    %c0_7 = arith.constant 0 : index
    %10 = vector.load %arg4[%c0_6, %c0_7] : memref<128x128xbf16, #tpu.memory_space<vmem>>, vector<128x128xbf16>
    %cst_8 = arith.constant dense<0.000000e+00> : vector<8x128xf32>
    %11 = tpu.matmul %9, %10, %cst_8 {dimension_numbers = #tpu.dot_dimension_numbers<[1], [0], [0], [1], [0, 0, 1, 1], [], []>} : vector<8x128xbf16>, vector<128x128xbf16>, vector<8x128xf32> -> vector<8x128xf32>
    %c0_9 = arith.constant 0 : index
    %c0_10 = arith.constant 0 : index
    %12 = vector.load %arg5[%c0_9, %c0_10] : memref<1x128xf32, #tpu.memory_space<vmem>>, vector<1x128xf32>
    %13 = vector.broadcast %12 : vector<1x128xf32> to vector<8x128xf32>
    %14 = arith.addf %11, %13 : vector<8x128xf32>
    %cst_11 = arith.constant 0.000000e+00 : f32
    %15 = vector.broadcast %cst_11 : f32 to vector<8x128xf32>
    %16 = arith.maximumf %14, %15 : vector<8x128xf32>
    %17 = arith.truncf %16 : vector<8x128xf32> to vector<8x128xbf16>
    %c0_12 = arith.constant 0 : index
    %c0_13 = arith.constant 0 : index
    %18 = vector.load %arg6[%c0_12, %c0_13] : memref<128x64xbf16, #tpu.memory_space<vmem>>, vector<128x64xbf16>
    %cst_14 = arith.constant dense<0.000000e+00> : vector<8x64xf32>
    %19 = tpu.matmul %17, %18, %cst_14 {dimension_numbers = #tpu.dot_dimension_numbers<[1], [0], [0], [1], [0, 0, 1, 1], [], []>} : vector<8x128xbf16>, vector<128x64xbf16>, vector<8x64xf32> -> vector<8x64xf32>
    %c0_15 = arith.constant 0 : index
    %c0_16 = arith.constant 0 : index
    %20 = vector.load %arg1[%c0_15, %c0_16] : memref<8x64xf32, #tpu.memory_space<vmem>>, vector<8x64xf32>
    %21 = arith.truncf %20 : vector<8x64xf32> to vector<8x64xbf16>
    %c0_17 = arith.constant 0 : index
    %c0_18 = arith.constant 0 : index
    %22 = vector.load %arg7[%c0_17, %c0_18] : memref<64x64xbf16, #tpu.memory_space<vmem>>, vector<64x64xbf16>
    %cst_19 = arith.constant dense<0.000000e+00> : vector<8x64xf32>
    %23 = tpu.matmul %21, %22, %cst_19 {dimension_numbers = #tpu.dot_dimension_numbers<[1], [0], [0], [1], [0, 0, 1, 1], [], []>} : vector<8x64xbf16>, vector<64x64xbf16>, vector<8x64xf32> -> vector<8x64xf32>
    %24 = arith.addf %19, %23 : vector<8x64xf32>
    %c0_20 = arith.constant 0 : index
    %c0_21 = arith.constant 0 : index
    %25 = vector.load %arg8[%c0_20, %c0_21] : memref<1x64xf32, #tpu.memory_space<vmem>>, vector<1x64xf32>
    %26 = vector.broadcast %25 : vector<1x64xf32> to vector<8x64xf32>
    %27 = arith.addf %24, %26 : vector<8x64xf32>
    %28 = arith.negf %27 : vector<8x64xf32>
    %29 = math.exp %28 : vector<8x64xf32>
    %cst_22 = arith.constant 1.000000e+00 : f32
    %30 = vector.broadcast %cst_22 : f32 to vector<8x64xf32>
    %31 = arith.addf %30, %29 : vector<8x64xf32>
    %32 = arith.divf %30, %31 : vector<8x64xf32>
    %c0_23 = arith.constant 0 : index
    %c0_24 = arith.constant 0 : index
    %33 = vector.load %arg9[%c0_23, %c0_24] : memref<8x64xf32, #tpu.memory_space<vmem>>, vector<8x64xf32>
    tpu.vector_store %arg9[%c0_23, %c0_24], %32 {strides = array<i32>} : memref<8x64xf32, #tpu.memory_space<vmem>>, vector<8x64xf32>,
    return
  }
  func.func @transform_0(%arg0: i32) -> (i32, i32) {
    %c0_i32 = arith.constant 0 : i32
    %c0_i32_0 = arith.constant 0 : i32
    return %arg0, %c0_i32 : i32, i32
  }
  func.func @transform_1(%arg0: i32) -> (i32, i32) {
    %c0_i32 = arith.constant 0 : i32
    %c0_i32_0 = arith.constant 0 : i32
    %c0_i32_1 = arith.constant 0 : i32
    return %c0_i32, %c0_i32_0 : i32, i32
  }
  func.func @transform_2(%arg0: i32) -> (i32, i32) {
    %c0_i32 = arith.constant 0 : i32
    %c0_i32_0 = arith.constant 0 : i32
    %c0_i32_1 = arith.constant 0 : i32
    return %c0_i32, %c0_i32_0 : i32, i32
  }
  func.func @transform_3(%arg0: i32) -> (i32, i32) {
    %c0_i32 = arith.constant 0 : i32
    %c0_i32_0 = arith.constant 0 : i32
    %c0_i32_1 = arith.constant 0 : i32
    return %c0_i32, %c0_i32_0 : i32, i32
  }
  func.func @transform_4(%arg0: i32) -> (i32, i32) {
    %c0_i32 = arith.constant 0 : i32
    %c0_i32_0 = arith.constant 0 : i32
    %c0_i32_1 = arith.constant 0 : i32
    return %c0_i32, %c0_i32_0 : i32, i32
  }
  func.func @transform_5(%arg0: i32) -> (i32, i32) {
    %c0_i32 = arith.constant 0 : i32
    %c0_i32_0 = arith.constant 0 : i32
    %c0_i32_1 = arith.constant 0 : i32
    return %c0_i32, %c0_i32_0 : i32, i32
  }
  func.func @transform_6(%arg0: i32) -> (i32, i32) {
    %c0_i32 = arith.constant 0 : i32
    %c0_i32_0 = arith.constant 0 : i32
    %c0_i32_1 = arith.constant 0 : i32
    return %c0_i32, %c0_i32_0 : i32, i32
  }
  func.func @transform_7(%arg0: i32) -> (i32, i32) {
    %c0_i32 = arith.constant 0 : i32
    %c0_i32_0 = arith.constant 0 : i32
    %c0_i32_1 = arith.constant 0 : i32
    return %c0_i32, %c0_i32_0 : i32, i32
  }
  func.func @transform_8(%arg0: i32) -> (i32, i32) {
    %c0_i32 = arith.constant 0 : i32
    %c0_i32_0 = arith.constant 0 : i32
    return %arg0, %c0_i32 : i32, i32
  }
}

</mosaic_0001>

<bundles_post_ra>
// kernel: tpu_custom_call.1
= control target key start
LH: loop header
LB: loop body
LE: loop exit
PB: predicated region body
PF: predicated region fallthrough
CT: control target
= control target key end

     0   :  { %13 = vsyncpa [#allocation3], 0  ;;  %s852_s0 = inlined_call_operand.hbm [shape: f32[8,64], index: 0, kind: input, shape index: {}]   ;;  %s853_s1 = inlined_call_operand.vmem [shape: bf16[64,128], index: 1, kind: input, shape index: {}]   ;;  %s854_s2 = inlined_call_operand.vmem [shape: f32[1,128], index: 2, kind: input, shape index: {}]   ;;  %s855_s3 = inlined_call_operand.vmem [shape: bf16[128,128], index: 3, kind: input, shape index: {}]   ;;  %s856_s4 = inlined_call_operand.vmem [shape: f32[1,128], index: 4, kind: input, shape index: {}]   ;;  %s857_s5 = inlined_call_operand.vmem [shape: bf16[128,64], index: 5, kind: input, shape index: {}]   ;;  %s858_s6 = inlined_call_operand.hbm [shape: bf16[64,64], index: 6, kind: input, shape index: {}]   ;;  %s859_s7 = inlined_call_operand.vmem [shape: f32[1,64], index: 7, kind: input, shape index: {}]   ;;  %s860_s8 = inlined_call_operand.hbm [shape: f32[8,64], index: 8, kind: output, shape index: {}]  }
   0x1   :  { %14 = vsyncpa [#allocation6], 0 }
   0x2   :  { %15 = vsyncpa [#allocation4], 0  ;;  %s687_s27 = smov [#allocation2]   ;;  %s688_s29 = smov [#allocation5]  }
   0x3   :  { %s22_s28 = sshll.u32 %s687_s27, 4  ;;  %s41_s30 = sshll.u32 %s688_s29, 4  ;;  %s23_s28 = int_to_ptr.vmem [resolvable:$true] %s22_s28  ;;  %s42_s30 = int_to_ptr.vmem [resolvable:$true] %s41_s30 }
   0x4   :  { %s629_s9 = scalar_lea.vmem %s23_s28, 128  ;;  %p634_p1 = scmp.lt.s32.totalorder %s23_s28, %s23_s28 }
   0x5   :  { %p630_p0 = scmp.ne.s32.totalorder %s23_s28, %s629_s9  ;;  %p635_p2 = scmp.lt.s32.totalorder %s629_s9, %s629_s9 }
   0x7   :  { %p636_p3 = por %p635_p2, %p634_p1 }
   0x9   :  { %p637_p4 = pnand %p636_p3, %p630_p0 }
   0xb   :  { %640 = shalt.err (!%p637_p4)
}
   0xc   :  { %25 = dma.hbm_to_vmem [thread:$0]  %s852_s0, 128, %s23_s28, [#allocation3]  }
   0xd   :  { %s649_s12 = scalar_lea.vmem %s42_s30, 512  ;;  %p654_p6 = scmp.lt.s32.totalorder %s42_s30, %s42_s30 }
   0xe   :  { %p650_p5 = scmp.ne.s32.totalorder %s42_s30, %s649_s12  ;;  %p655_p7 = scmp.lt.s32.totalorder %s649_s12, %s649_s12 }
  0x10   :  { %p656_p8 = por %p655_p7, %p654_p6 }
  0x12   :  { %p657_p9 = pnand %p656_p8, %p650_p5 }
  0x14   :  { %660 = shalt.err (!%p657_p9)
}
  0x15   :  { %s689_s13 = smov 64   ;;  %s690_s14 = smov 4  }
  0x16   :  { %47 = dma.hbm_to_vmem [thread:$0]  %s858_s6, 512, %s42_s30, [#allocation6], %s689_s13, %s689_s13, %s690_s14  }
  0x17   :  { %681 = dma.done.wait [#allocation3], 128  }
  0x18   :  { %682 = vsyncadd [#allocation3], 4294967168 }
  0x19   :  { %683 = dma.done.wait [#allocation6], 512  }
  0x1a   :  { %684 = vsyncadd [#allocation6], 4294966784  ;;  %v691_v0 = vmov 0.0   ;;  %vm692_vm0 = vmmov 0   ;;  %v593_v1 = vld [vmem:[%s853_s1 + $0x18] sm:$0xff]   ;;  %v594_v2 = vld [vmem:[%s853_s1 + $0x10] sm:$0xff]  }
  0x1b   :  { %522 = vmatprep.subr.bf16.mxu1 %v691_v0  ;;  %530 = vmatprep.mubr.msk.bf16.mxu1 %vm692_vm0, %v691_v0  ;;  %v595_v3 = vld [vmem:[%s853_s1 + $0x8] sm:$0xff]   ;;  %v596_v4 = vld [vmem:[%s853_s1] sm:$0xff]   ;;  %vm98_vm1 = vcmask 523264   ;;  %v597_v6 = vld [vmem:[%s855_s3 + $0x38] sm:$0xff]  }
  0x1c   :  { %554 = vmatprep.subr.bf16.mxu0 %v691_v0  ;;  %562 = vmatprep.mubr.msk.bf16.mxu0 %vm692_vm0, %v691_v0  ;;  %v57_v5 = vld [vmem:[#allocation2] sm:$0xff]  ;;  %v598_v8 = vld [vmem:[%s855_s3 + $0x30] sm:$0xff]   ;;  %v599_v9 = vld [vmem:[%s855_s3 + $0x28] sm:$0xff]  }
  0x1d   :  { %523 = vmatpush3.bf16.msra.mxu1 %v593_v1  ;;  %v58_v7 = vpack.c.bf16 %v57_v5, %v57_v5  ;;  %v600_v10 = vld [vmem:[%s855_s3 + $0x20] sm:$0xff]   ;;  %v601_v11 = vld [vmem:[%s855_s3 + $0x18] sm:$0xff]   ;;  %v602_v12 = vld [vmem:[%s855_s3 + $0x10] sm:$0xff]  }
  0x1e   :  { %524 = vmatprep.subr.bf16.mxu1 %v691_v0  ;;  %v603_v13 = vld [vmem:[%s855_s3 + $0x8] sm:$0xff]   ;;  %v604_v14 = vld [vmem:[%s855_s3] sm:$0xff]   ;;  %v606_v16 = vld [vmem:[#allocation5 + $0x10] sm:$0xff]  }
  0x1f   :  { %v605_v15 = vld [vmem:[#allocation5 + $0x18] sm:$0xff]   ;;  %v607_v17 = vld [vmem:[#allocation5 + $0x8] sm:$0xff]   ;;  %v608_v18 = vld [vmem:[#allocation5] sm:$0xff]  }
  0x20   :  { %555 = vmatpush3.bf16.msra.mxu0 %v605_v15  ;;  %v609_v19 = vld [vmem:[%s857_s5 + $0x38] sm:$0xff]   ;;  %v610_v20 = vld [vmem:[%s857_s5 + $0x30] sm:$0xff]   ;;  %v611_v21 = vld [vmem:[%s857_s5 + $0x28] sm:$0xff]  }
  0x21   :  { %525 = vmatpush3.bf16.msra.mxu1 %v594_v2  ;;  %556 = vmatprep.subr.bf16.mxu0 %v691_v0  ;;  %v612_v22 = vld [vmem:[%s857_s5 + $0x20] sm:$0xff]   ;;  %v613_v23 = vld [vmem:[%s857_s5 + $0x18] sm:$0xff]   ;;  %v614_v24 = vld [vmem:[%s857_s5 + $0x10] sm:$0xff]  }
  0x22   :  { %526 = vmatprep.subr.bf16.mxu1 %v691_v0  ;;  %v464_v25 = vld [vmem:[%s854_s2] ss:$0 sm:$0xff]  ;;  %v615_v33 = vld [vmem:[%s857_s5 + $0x8] sm:$0xff]  }
  0x23   :  { %v616_v34 = vld [vmem:[%s857_s5] sm:$0xff]  }
  0x24   :  { %557 = vmatpush3.bf16.msra.mxu0 %v606_v16  ;;  %v470_v39 = vld [vmem:[%s856_s4] ss:$0 sm:$0xff]  ;;  %s693_s4 = smov [#allocation7]  }
  0x25   :  { %527 = vmatpush3.bf16.msra.mxu1 %v595_v3  ;;  %558 = vmatprep.subr.bf16.mxu0 %v691_v0  ;;  %v492_v48 = vld [vmem:[%s859_s7] ss:$0 sm:$0xff]  ;;  %s454_s10 = sshll.u32 %s693_s4, 4  ;;  %s455_s10 = int_to_ptr.vmem [resolvable:$true] %s454_s10 }
  0x26   :  { %528 = vmatprep.subr.bf16.mxu1 %v691_v0  ;;  %s661_s11 = scalar_lea.vmem %s455_s10, 128  ;;  %p666_p11 = scmp.lt.s32.totalorder %s455_s10, %s455_s10 }
  0x27   :  { %p662_p10 = scmp.ne.s32.totalorder %s455_s10, %s661_s11  ;;  %p667_p12 = scmp.lt.s32.totalorder %s661_s11, %s661_s11 }
  0x28   :  { %559 = vmatpush3.bf16.msra.mxu0 %v607_v17 }
  0x29   :  { %529 = vmatpush3.bf16.msra.mxu1 %v596_v4  ;;  %560 = vmatprep.subr.bf16.mxu0 %v691_v0  ;;  %p668_p13 = por %p667_p12, %p666_p11 }
  0x2a   :  { %534 = vmatprep.subr.bf16.mxu1 %v691_v0 }
  0x2b   :  { %p669_p0 = pnand %p668_p13, %p662_p10 }
  0x2c   :  { %531 = vmatmul.mubr.msk.bf16.vlgmr.msra.gmra.mxu1 %vm98_vm1, %v58_v7  ;;  %561 = vmatpush3.bf16.msra.mxu0 %v608_v18 }
  0x2d   :  { %535 = vmatpush3.bf16.msra.mxu1 %v597_v6  ;;  %550 = vmatprep.mubr.msk.bf16.mxu1 %vm692_vm0, %v691_v0 }
  0x2e   :  { %536 = vmatprep.subr.bf16.mxu1 %v691_v0  ;;  %566 = vmatprep.subr.bf16.mxu0 %v691_v0 }
  0x2f   :  { %563 = vmatmul.mubr.msk.bf16.vlgmr.msra.gmra.mxu0 %vm98_vm1, %v58_v7 }
  0x30   :  { %567 = vmatpush3.bf16.msra.mxu0 %v609_v19  ;;  %582 = vmatprep.mubr.msk.bf16.mxu0 %vm692_vm0, %v691_v0 }
  0x31   :  { %537 = vmatpush3.bf16.msra.mxu1 %v598_v8  ;;  %568 = vmatprep.subr.bf16.mxu0 %v691_v0 }
  0x32   :  { %538 = vmatprep.subr.bf16.mxu1 %v691_v0 }
  0x34   :  { %569 = vmatpush3.bf16.msra.mxu0 %v610_v20 }
  0x35   :  { %539 = vmatpush3.bf16.msra.mxu1 %v599_v9  ;;  %570 = vmatprep.subr.bf16.mxu0 %v691_v0 }
  0x36   :  { %540 = vmatprep.subr.bf16.mxu1 %v691_v0 }
  0x38   :  { %571 = vmatpush3.bf16.msra.mxu0 %v611_v21 }
  0x39   :  { %541 = vmatpush3.bf16.msra.mxu1 %v600_v10  ;;  %572 = vmatprep.subr.bf16.mxu0 %v691_v0 }
  0x3a   :  { %542 = vmatprep.subr.bf16.mxu1 %v691_v0 }
  0x3c   :  { %573 = vmatpush3.bf16.msra.mxu0 %v612_v22 }
  0x3d   :  { %543 = vmatpush3.bf16.msra.mxu1 %v601_v11  ;;  %574 = vmatprep.subr.bf16.mxu0 %v691_v0 }
  0x3e   :  { %544 = vmatprep.subr.bf16.mxu1 %v691_v0 }
  0x40   :  { %575 = vmatpush3.bf16.msra.mxu0 %v613_v23 }
  0x41   :  { %545 = vmatpush3.bf16.msra.mxu1 %v602_v12  ;;  %576 = vmatprep.subr.bf16.mxu0 %v691_v0 }
  0x42   :  { %546 = vmatprep.subr.bf16.mxu1 %v691_v0 }
  0x44   :  { %577 = vmatpush3.bf16.msra.mxu0 %v614_v24 }
  0x45   :  { %547 = vmatpush3.bf16.msra.mxu1 %v603_v13  ;;  %578 = vmatprep.subr.bf16.mxu0 %v691_v0 }
  0x46   :  { %548 = vmatprep.subr.bf16.mxu1 %v691_v0 }
  0x48   :  { %579 = vmatpush3.bf16.msra.mxu0 %v615_v33 }
  0x49   :  { %549 = vmatpush3.bf16.msra.mxu1 %v604_v14  ;;  %580 = vmatprep.subr.bf16.mxu0 %v691_v0 }
  0x4c   :  { %581 = vmatpush3.bf16.msra.mxu0 %v616_v34 }
  0xec   :  { %v136_v26 = vpop.f32.mrf.mxu1 }
  0xed   :  { %v137_v27 = vadd.f32 %v464_v25, %v136_v26 }
  0xee   :  { %v532_v28 = vpop.f32.mrf.mxu1 }
  0xef   :  { %v142_v29 = vmax.f32 %v137_v27, 0.0  ;;  %v339_v35 = vpop.f32.mrf.mxu0 }
  0xf0   :  { %v139_v30 = vpop.f32.mrf.mxu1 }
  0xf1   :  { %v143_v31 = vpack.c.bf16 %v142_v29, %v142_v29  ;;  %v564_v36 = vpop.f32.mrf.mxu0 }
  0xf2   :  { %v533_v32 = vpop.f32.mrf.mxu1 }
  0xf3   :  { %551 = vmatmul.mubr.bf16.vlgmr.msra.gmra.mxu1 %v143_v31  ;;  %v342_v37 = vpop.f32.mrf.mxu0 }
  0xf5   :  { %v565_v38 = vpop.f32.mrf.mxu0 }
 0x1b3   :  { %v249_v40 = vpop.f32.mrf.mxu1 }
 0x1b4   :  { %v250_v41 = vadd.f32 %v470_v39, %v249_v40 }
 0x1b5   :  { %v552_v42 = vpop.f32.mrf.mxu1 }
 0x1b6   :  { %v255_v43 = vmax.f32 %v250_v41, 0.0 }
 0x1b7   :  { %v252_v44 = vpop.f32.mrf.mxu1 }
 0x1b8   :  { %v256_v45 = vpack.c.bf16 %v255_v43, %v255_v43 }
 0x1b9   :  { %v553_v46 = vpop.f32.mrf.mxu1 }
 0x1ba   :  { %583 = vmatmul.mubr.bf16.vlgmr.msra.gmra.mxu0 %v256_v45 }
 0x27a   :  { %v427_v47 = vpop.f32.mrf.mxu0 }
 0x27b   :  { %v428_v49 = vadd.f32 %v427_v47, %v339_v35 }
 0x27c   :  { %v584_v50 = vpop.f32.mrf.mxu0 }
 0x27d   :  { %v440_v51 = vadd.f32 %v492_v48, %v428_v49 }
 0x27e   :  { %v430_v52 = vpop.f32.mrf.mxu0 }
 0x27f   :  { %v493_v53 = vmul.f32 -1.442695, %v440_v51 }
 0x280   :  { %v585_v54 = vpop.f32.mrf.mxu0 }
 0x281   :  { %617 = vpow2.f32 %v493_v53 }
 0x28e   :  { %v618_v55 = vpop.eup %617 }
 0x28f   :  { %v444_v56 = vadd.f32 1.0, %v618_v55 }
 0x291   :  { %619 = vrcp.f32 %v444_v56 }
 0x29e   :  { %v620_v57 = vpop.eup %619 }
 0x29f   :  { %447 = vst.msk [vmem:[#allocation7] sm:$0xff] %vm98_vm1, %v620_v57 }
 0x2a0   :  { %672 = shalt.err (!%p669_p0)
}
 0x2a1   :  { %457 = dma.vmem_to_hbm [thread:$0]  %s455_s10, 128, %s860_s8, [#allocation4]  }
 0x2a2   :  { %685 = dma.done.wait [#allocation4], 128  }
 0x2a3   :  { %686 = vsyncadd [#allocation4], 4294967168 }
 0x2a4   :  { %461 = vsyncpa [#allocation3], 1 }
 0x2a5   :  { %462 = vsyncpa [#allocation6], 1 }
 0x2a6   :  { %463 = vsyncpa [#allocation4], 1 }

</bundles_post_ra>
